<compile_context>
chip_gen: v6e
topology: v6e:2x2x1
jax: 0.10.0
libtpu: 0.0.40
codegen_flags: <defaults>
</compile_context>

<pallas_src>
import functools
import math

import jax
import jax.numpy as jnp
from jax import lax
from jax.experimental import pallas as pl
from jax.experimental.pallas import tpu as pltpu

_EPS = 1e-07
_LANE = 128
_SUB = 8
_NCORES = 2


def _max_tile_rows():
    # 4096 rows -> 2 MiB per f32 input buffer; 2 inputs x 2 pipeline buffers = 8 MiB,
    # safe inside v7x's 32 MiB scoped default (64 MiB physical VMEM).  Chips with
    # 128 MiB VMEM (v5e/v6e) take 8192-row tiles to halve the per-step overhead.
    try:
        info = pltpu.get_tpu_info()
        vmem = getattr(info, "vmem_capacity_bytes", 0) or 0
        if vmem >= (96 << 20):
            return 8192
    except Exception:
        pass
    return 4096


def _iou_kernel(pr_ref, gt_ref, acc_ref, *, threshold, valid_rows, tile_rows,
                num_blocks, blocks_per_core, ragged, guard):
    c = pl.program_id(0)
    i = pl.program_id(1)
    blk = c * blocks_per_core + i

    @pl.when(i == 0)
    def _():
        acc_ref[...] = jnp.zeros_like(acc_ref)

    def _transform(x):
        x = x.astype(jnp.float32)
        if threshold is None:
            # sigmoid(x) == 0.5*tanh(0.5*x)+0.5 : one EUP op, no f32 divide on the VALU.
            return 0.5 * jnp.tanh(0.5 * x) + 0.5
        if 0.0 < threshold < 1.0:
            # sigmoid(x) > t  <=>  x > logit(t): skip the transcendental entirely.
            return (x > math.log(threshold / (1.0 - threshold))).astype(jnp.float32)
        # Exotic thresholds (<=0 or >=1): fall back to the explicit sigmoid compare.
        return (jax.nn.sigmoid(x) > threshold).astype(jnp.float32)

    def _accumulate(mask_rows):
        pr = _transform(pr_ref[...])
        gt = gt_ref[...].astype(jnp.float32)
        if mask_rows:
            # Only whole out-of-bounds rows of the ragged last block need masking
            # (lane tails / sub-8-row remainders are handled in the wrapper epilogue).
            row_idx = lax.broadcasted_iota(jnp.int32, (tile_rows, 1), 0)
            valid = (blk * tile_rows + row_idx) < valid_rows
            pr = jnp.where(valid, pr, 0.0)   # `where` so OOB NaNs never propagate
            gt = jnp.where(valid, gt, 0.0)
        nsub = tile_rows // _SUB
        # (tile_rows,128)->(nsub,8,128) keeps (8,128) tile boundaries; the axis-0 sum
        # lowers to a chain of vreg adds (pure VPU, no relayout / XLU).
        acc_ref[0] += jnp.sum((gt * pr).reshape(nsub, _SUB, _LANE), axis=0)
        acc_ref[1] += jnp.sum(gt.reshape(nsub, _SUB, _LANE), axis=0)
        acc_ref[2] += jnp.sum(pr.reshape(nsub, _SUB, _LANE), axis=0)

    if ragged:
        @pl.when(blk < num_blocks - 1)
        def _():
            _accumulate(False)            # full-rate, unmasked path (>99% of blocks)

        @pl.when(blk == num_blocks - 1)
        def _():
            _accumulate(True)             # row-masked path, ragged last block only
    elif guard:
        @pl.when(blk < num_blocks)
        def _():
            _accumulate(False)            # skip clamped duplicate blocks entirely
    else:
        _accumulate(False)


def iou_binary(pr, gt, threshold=None, eps=_EPS):
    """Pallas equivalent of IoU_Binary(threshold).forward(input, target) -> scalar f32."""
    assert pr.shape == gt.shape
    total = int(pr.size)

    pr_flat = pr.reshape(-1)
    gt_flat = gt.reshape(-1)

    body_rows = total // _LANE
    max_rows = _max_tile_rows()

    if body_rows > max_rows:
        # Large input: stream all full 128-lane rows; a possibly-ragged last block
        # is handled by the gated row mask inside the kernel.
        kernel_rows = body_rows
        tile_rows = max_rows
    else:
        # Small input: single block equal to the (sublane-aligned) body; any sub-8-row
        # remainder is tiny and goes to the epilogue, so no OOB rows exist at all.
        kernel_rows = (body_rows // _SUB) * _SUB
        tile_rows = kernel_rows

    kernel_elems = kernel_rows * _LANE

    inter = jnp.float32(0.0)
    s_gt = jnp.float32(0.0)
    s_pr = jnp.float32(0.0)

    if kernel_rows > 0:
        if kernel_elems == total:
            pr2 = pr_flat.reshape(kernel_rows, _LANE)     # free reshape, no copy
            gt2 = gt_flat.reshape(kernel_rows, _LANE)
        else:
            # TODO(synk): for huge non-128-aligned tensors this prefix slice still
            # materializes one extra copy; acceptable fallback for ragged sizes.
            pr2 = pr_flat[:kernel_elems].reshape(kernel_rows, _LANE)
            gt2 = gt_flat[:kernel_elems].reshape(kernel_rows, _LANE)

        num_blocks = -(-kernel_rows // tile_rows)
        ncores = min(_NCORES, num_blocks)
        blocks_per_core = -(-num_blocks // ncores)
        ragged = (kernel_rows % tile_rows) != 0
        guard = (ncores * blocks_per_core) != num_blocks

        def in_map(c, i):
            # Clamp: an idle core re-points at the last block (same index every step,
            # so its DMA is elided) and its contribution is skipped in the kernel.
            return (jnp.minimum(c * blocks_per_core + i, num_blocks - 1), 0)

        kernel = functools.partial(
            _iou_kernel, threshold=threshold, valid_rows=kernel_rows,
            tile_rows=tile_rows, num_blocks=num_blocks,
            blocks_per_core=blocks_per_core, ragged=ragged, guard=guard)

        cp_kwargs = dict(dimension_semantics=("parallel", "arbitrary"))
        if tile_rows > 4096:
            # 8192-row tiles need ~16 MiB of input buffers; raise v5e's 16 MiB
            # scoped-VMEM default explicitly (128 MiB physical on v5e/v6e).
            cp_kwargs["vmem_limit_bytes"] = 64 << 20

        parts = pl.pallas_call(
            kernel,
            out_shape=jax.ShapeDtypeStruct((ncores, 3, _SUB, _LANE), jnp.float32),
            grid_spec=pltpu.PrefetchScalarGridSpec(
                num_scalar_prefetch=0,
                grid=(ncores, blocks_per_core),
                in_specs=[
                    pl.BlockSpec((tile_rows, _LANE), in_map),
                    pl.BlockSpec((tile_rows, _LANE), in_map),
                ],
                out_specs=pl.BlockSpec((None, 3, _SUB, _LANE),
                                       lambda c, i: (c, 0, 0, 0)),
            ),
            compiler_params=pltpu.CompilerParams(**cp_kwargs),
        )(pr2, gt2)

        # Tiny epilogue: combine per-core vreg partials.
        sums = jnp.sum(parts, axis=(0, 2, 3))   # [intersection, sum(gt), sum(pr)]
        inter, s_gt, s_pr = sums[0], sums[1], sums[2]

    if kernel_elems != total:
        # Remainder (<8 rows + <128-element lane tail, i.e. <1024 elements): plain jnp,
        # matching the reference exactly, folded into the final sums.
        tp = jax.nn.sigmoid(pr_flat[kernel_elems:].astype(jnp.float32))
        tg = gt_flat[kernel_elems:].astype(jnp.float32)
        if threshold is not None:
            tp = (tp > threshold).astype(jnp.float32)
        inter = inter + jnp.sum(tg * tp)
        s_gt = s_gt + jnp.sum(tg)
        s_pr = s_pr + jnp.sum(tp)

    union = s_gt + s_pr - inter + eps
    return (inter + eps) / union


def _iou_ref(pr, gt, threshold=None, eps=_EPS):
    pr = jax.nn.sigmoid(pr.astype(jnp.float32))
    if threshold is not None:
        pr = (pr > threshold).astype(jnp.float32)
    gt = gt.astype(jnp.float32)
    inter = jnp.sum(gt * pr)
    union = jnp.sum(gt) + jnp.sum(pr) - inter + eps
    return (inter + eps) / union


if __name__ == "__main__":
    key = jax.random.PRNGKey(0)
    k1, k2 = jax.random.split(key)
    # NCHW-style small shapes: batch=2, channels=4, spatial=16x16
    logits = jax.random.normal(k1, (2, 4, 16, 16), dtype=jnp.float32)
    target = (jax.random.uniform(k2, (2, 4, 16, 16)) > 0.5).astype(jnp.float32)

    out = jax.block_until_ready(iou_binary(logits, target, threshold=None))
    ref = jax.block_until_ready(_iou_ref(logits, target, threshold=None))
    assert jnp.allclose(out, ref, rtol=1e-5, atol=1e-6), (out, ref)

    out_t = jax.block_until_ready(iou_binary(logits, target, threshold=0.5))
    ref_t = jax.block_until_ready(_iou_ref(logits, target, threshold=0.5))
    assert jnp.allclose(out_t, ref_t, rtol=1e-5, atol=1e-6), (out_t, ref_t)

    print("KERNEL_OK")
</pallas_src>

<mosaic_0001>
module attributes {stable_mosaic.version = 11 : i64} {
  func.func @_iou_kernel(%arg0: i32, %arg1: i32, %arg2: memref<16x128xf32, #tpu.memory_space<vmem>>, %arg3: memref<16x128xf32, #tpu.memory_space<vmem>>, %arg4: memref<1x3x8x128xf32, #tpu.memory_space<vmem>>) attributes {dimension_semantics = [#tpu.dimension_semantics<parallel>, #tpu.dimension_semantics<arbitrary>], iteration_bounds = array<i64: 1, 1>, scalar_prefetch = 0 : i64, scratch_operands = 0 : i64, tpu.core_type = #tpu.core_type<tc>, window_params = [{transform_indices = @transform_0, window_bounds = array<i64: 16, 128>}, {transform_indices = @transform_1, window_bounds = array<i64: 16, 128>}, {transform_indices = @transform_2, window_bounds = array<i64: 1, 3, 8, 128>}]} {
    %c0_i32 = arith.constant 0 : i32
    %0 = arith.cmpi eq, %arg1, %c0_i32 : i32
    %1 = arith.extui %0 : i1 to i32
    %c0_i32_0 = arith.constant 0 : i32
    %2 = arith.cmpi ne, %1, %c0_i32_0 : i32
    scf.if %2 {
      %cst_31 = arith.constant 0.000000e+00 : f32
      %37 = vector.broadcast %cst_31 : f32 to vector<3x8x128xf32>
      %c0_32 = arith.constant 0 : index
      %c0_33 = arith.constant 0 : index
      %c0_34 = arith.constant 0 : index
      %c0_35 = arith.constant 0 : index
      %38 = vector.load %arg4[%c0_32, %c0_33, %c0_34, %c0_35] : memref<1x3x8x128xf32, #tpu.memory_space<vmem>>, vector<1x3x8x128xf32>
      %39 = vector.shape_cast %38 : vector<1x3x8x128xf32> to vector<3x8x128xf32>
      %40 = vector.shape_cast %37 : vector<3x8x128xf32> to vector<1x3x8x128xf32>
      tpu.vector_store %arg4[%c0_32, %c0_33, %c0_34, %c0_35], %40 {strides = array<i32>} : memref<1x3x8x128xf32, #tpu.memory_space<vmem>>, vector<1x3x8x128xf32>,
    } else {
    }
    %c0 = arith.constant 0 : index
    %c0_1 = arith.constant 0 : index
    %3 = vector.load %arg2[%c0, %c0_1] : memref<16x128xf32, #tpu.memory_space<vmem>>, vector<16x128xf32>
    %cst = arith.constant 5.000000e-01 : f32
    %4 = vector.broadcast %cst : f32 to vector<16x128xf32>
    %5 = arith.mulf %4, %3 : vector<16x128xf32>
    %6 = math.tanh %5 : vector<16x128xf32>
    %cst_2 = arith.constant 5.000000e-01 : f32
    %7 = vector.broadcast %cst_2 : f32 to vector<16x128xf32>
    %8 = arith.mulf %7, %6 : vector<16x128xf32>
    %cst_3 = arith.constant 5.000000e-01 : f32
    %9 = vector.broadcast %cst_3 : f32 to vector<16x128xf32>
    %10 = arith.addf %8, %9 : vector<16x128xf32>
    %c0_4 = arith.constant 0 : index
    %c0_5 = arith.constant 0 : index
    %11 = vector.load %arg3[%c0_4, %c0_5] : memref<16x128xf32, #tpu.memory_space<vmem>>, vector<16x128xf32>
    %c0_6 = arith.constant 0 : index
    %c0_7 = arith.constant 0 : index
    %c0_8 = arith.constant 0 : index
    %c0_9 = arith.constant 0 : index
    %12 = vector.load %arg4[%c0_6, %c0_7, %c0_8, %c0_9] : memref<1x3x8x128xf32, #tpu.memory_space<vmem>>, vector<1x1x8x128xf32>
    %13 = vector.shape_cast %12 : vector<1x1x8x128xf32> to vector<8x128xf32>
    %14 = arith.mulf %11, %10 : vector<16x128xf32>
    %15 = vector.shape_cast %14 : vector<16x128xf32> to vector<2x8x128xf32>
    %cst_10 = arith.constant dense<0.000000e+00> : vector<8x128xf32>
    %16 = vector.multi_reduction <add>, %15, %cst_10 [0] : vector<2x8x128xf32> to vector<8x128xf32>
    %17 = arith.addf %13, %16 : vector<8x128xf32>
    %c0_11 = arith.constant 0 : index
    %c0_12 = arith.constant 0 : index
    %c0_13 = arith.constant 0 : index
    %c0_14 = arith.constant 0 : index
    %18 = vector.load %arg4[%c0_11, %c0_12, %c0_13, %c0_14] : memref<1x3x8x128xf32, #tpu.memory_space<vmem>>, vector<1x1x8x128xf32>
    %19 = vector.shape_cast %18 : vector<1x1x8x128xf32> to vector<8x128xf32>
    %20 = vector.shape_cast %17 : vector<8x128xf32> to vector<1x1x8x128xf32>
    tpu.vector_store %arg4[%c0_11, %c0_12, %c0_13, %c0_14], %20 {strides = array<i32>} : memref<1x3x8x128xf32, #tpu.memory_space<vmem>>, vector<1x1x8x128xf32>,
    %c0_15 = arith.constant 0 : index
    %c1 = arith.constant 1 : index
    %c0_16 = arith.constant 0 : index
    %c0_17 = arith.constant 0 : index
    %21 = vector.load %arg4[%c0_15, %c1, %c0_16, %c0_17] : memref<1x3x8x128xf32, #tpu.memory_space<vmem>>, vector<1x1x8x128xf32>
    %22 = vector.shape_cast %21 : vector<1x1x8x128xf32> to vector<8x128xf32>
    %23 = vector.shape_cast %11 : vector<16x128xf32> to vector<2x8x128xf32>
    %cst_18 = arith.constant dense<0.000000e+00> : vector<8x128xf32>
    %24 = vector.multi_reduction <add>, %23, %cst_18 [0] : vector<2x8x128xf32> to vector<8x128xf32>
    %25 = arith.addf %22, %24 : vector<8x128xf32>
    %c0_19 = arith.constant 0 : index
    %c1_20 = arith.constant 1 : index
    %c0_21 = arith.constant 0 : index
    %c0_22 = arith.constant 0 : index
    %26 = vector.load %arg4[%c0_19, %c1_20, %c0_21, %c0_22] : memref<1x3x8x128xf32, #tpu.memory_space<vmem>>, vector<1x1x8x128xf32>
    %27 = vector.shape_cast %26 : vector<1x1x8x128xf32> to vector<8x128xf32>
    %28 = vector.shape_cast %25 : vector<8x128xf32> to vector<1x1x8x128xf32>
    tpu.vector_store %arg4[%c0_19, %c1_20, %c0_21, %c0_22], %28 {strides = array<i32>} : memref<1x3x8x128xf32, #tpu.memory_space<vmem>>, vector<1x1x8x128xf32>,
    %c0_23 = arith.constant 0 : index
    %c2 = arith.constant 2 : index
    %c0_24 = arith.constant 0 : index
    %c0_25 = arith.constant 0 : index
    %29 = vector.load %arg4[%c0_23, %c2, %c0_24, %c0_25] : memref<1x3x8x128xf32, #tpu.memory_space<vmem>>, vector<1x1x8x128xf32>
    %30 = vector.shape_cast %29 : vector<1x1x8x128xf32> to vector<8x128xf32>
    %31 = vector.shape_cast %10 : vector<16x128xf32> to vector<2x8x128xf32>
    %cst_26 = arith.constant dense<0.000000e+00> : vector<8x128xf32>
    %32 = vector.multi_reduction <add>, %31, %cst_26 [0] : vector<2x8x128xf32> to vector<8x128xf32>
    %33 = arith.addf %30, %32 : vector<8x128xf32>
    %c0_27 = arith.constant 0 : index
    %c2_28 = arith.constant 2 : index
    %c0_29 = arith.constant 0 : index
    %c0_30 = arith.constant 0 : index
    %34 = vector.load %arg4[%c0_27, %c2_28, %c0_29, %c0_30] : memref<1x3x8x128xf32, #tpu.memory_space<vmem>>, vector<1x1x8x128xf32>
    %35 = vector.shape_cast %34 : vector<1x1x8x128xf32> to vector<8x128xf32>
    %36 = vector.shape_cast %33 : vector<8x128xf32> to vector<1x1x8x128xf32>
    tpu.vector_store %arg4[%c0_27, %c2_28, %c0_29, %c0_30], %36 {strides = array<i32>} : memref<1x3x8x128xf32, #tpu.memory_space<vmem>>, vector<1x1x8x128xf32>,
    return
  }
  func.func @transform_0(%arg0: i32, %arg1: i32) -> (i32, i32) {
    %c1_i32 = arith.constant 1 : i32
    %0 = arith.muli %arg0, %c1_i32 : i32
    %1 = arith.addi %0, %arg1 : i32
    %c0_i32 = arith.constant 0 : i32
    %2 = arith.minsi %1, %c0_i32 : i32
    %c0_i32_0 = arith.constant 0 : i32
    %c0_i32_1 = arith.constant 0 : i32
    return %2, %c0_i32_0 : i32, i32
  }
  func.func @transform_1(%arg0: i32, %arg1: i32) -> (i32, i32) {
    %c1_i32 = arith.constant 1 : i32
    %0 = arith.muli %arg0, %c1_i32 : i32
    %1 = arith.addi %0, %arg1 : i32
    %c0_i32 = arith.constant 0 : i32
    %2 = arith.minsi %1, %c0_i32 : i32
    %c0_i32_0 = arith.constant 0 : i32
    %c0_i32_1 = arith.constant 0 : i32
    return %2, %c0_i32_0 : i32, i32
  }
  func.func @transform_2(%arg0: i32, %arg1: i32) -> (i32, i32, i32, i32) {
    %c0_i32 = arith.constant 0 : i32
    %c0_i32_0 = arith.constant 0 : i32
    %c0_i32_1 = arith.constant 0 : i32
    %c0_i32_2 = arith.constant 0 : i32
    return %arg0, %c0_i32, %c0_i32_0, %c0_i32_1 : i32, i32, i32, i32
  }
}

</mosaic_0001>

<bundles_post_ra>
// kernel: tpu_custom_call.1
= control target key start
LH: loop header
LB: loop body
LE: loop exit
PB: predicated region body
PF: predicated region fallthrough
CT: control target
= control target key end

     0   :  { %7 = vsyncpa [#allocation3], 0  ;;  %s231_s0 = inlined_call_operand.hbm [shape: f32[16,128], index: 0, kind: input, shape index: {}]   ;;  %s232_s1 = inlined_call_operand.hbm [shape: f32[16,128], index: 1, kind: input, shape index: {}]   ;;  %s233_s2 = inlined_call_operand.hbm [shape: f32[1,3,8,128], index: 2, kind: output, shape index: {}]  }
   0x1   :  { %8 = vsyncpa [#allocation6], 0 }
   0x2   :  { %9 = vsyncpa [#allocation4], 0  ;;  %s193_s9 = smov [#allocation2]  }
   0x3   :  { %s21_s10 = sshll.u32 %s193_s9, 4  ;;  %s22_s10 = int_to_ptr.vmem [resolvable:$true] %s21_s10 }
   0x4   :  { %s135_s11 = scalar_lea.vmem %s22_s10, 256  ;;  %p140_p1 = scmp.lt.s32.totalorder %s22_s10, %s22_s10 }
   0x5   :  { %p136_p0 = scmp.ne.s32.totalorder %s22_s10, %s135_s11  ;;  %p141_p2 = scmp.lt.s32.totalorder %s135_s11, %s135_s11 }
   0x7   :  { %p142_p3 = por %p141_p2, %p140_p1 }
   0x9   :  { %p143_p4 = pnand %p142_p3, %p136_p0 }
   0xb   :  { %146 = shalt.err (!%p143_p4)
}
   0xc   :  { %s194_s12 = smov 128   ;;  %s195_s13 = smov 8  }
   0xd   :  { %27 = dma.hbm_to_vmem [thread:$0]  %s231_s0, 256, %s22_s10, [#allocation3], %s194_s12, %s194_s12, %s195_s13  }
   0xe   :  { %s196_s16 = smov [#allocation5]  }
   0xf   :  { %s39_s17 = sshll.u32 %s196_s16, 4  ;;  %s40_s17 = int_to_ptr.vmem [resolvable:$true] %s39_s17 }
  0x10   :  { %s155_s18 = scalar_lea.vmem %s40_s17, 256  ;;  %p160_p6 = scmp.lt.s32.totalorder %s40_s17, %s40_s17 }
  0x11   :  { %p156_p5 = scmp.ne.s32.totalorder %s40_s17, %s155_s18  ;;  %p161_p7 = scmp.lt.s32.totalorder %s155_s18, %s155_s18 }
  0x13   :  { %p162_p8 = por %p161_p7, %p160_p6 }
  0x15   :  { %p163_p9 = pnand %p162_p8, %p156_p5 }
  0x17   :  { %166 = shalt.err (!%p163_p9)
}
  0x18   :  { %45 = dma.hbm_to_vmem [thread:$0]  %s232_s1, 256, %s40_s17, [#allocation6], %s194_s12, %s194_s12, %s195_s13  }
  0x19   :  { %187 = dma.done.wait [#allocation3], 256  }
  0x1a   :  { %188 = vsyncadd [#allocation3], 4294967040 }
  0x1b   :  { %189 = dma.done.wait [#allocation6], 256  }
  0x1c   :  { %190 = vsyncadd [#allocation6], 4294967040  ;;  %v67_v0 = vld [vmem:[#allocation2] sm:$0xff]  ;;  %v68_v1 = vld [vmem:[#allocation2 + $0x8] sm:$0xff]  ;;  %s197_s0 = smov [#allocation7]  }
  0x1d   :  { %v69_v2 = vmul.f32 0.5, %v67_v0  ;;  %v70_v3 = vmul.f32 0.5, %v68_v1  ;;  %v77_v4 = vld [vmem:[#allocation5] sm:$0xff]  ;;  %v78_v5 = vld [vmem:[#allocation5 + $0x8] sm:$0xff]  ;;  %s100_s1 = sshll.u32 %s197_s0, 4  ;;  %s101_s1 = int_to_ptr.vmem [resolvable:$true] %s100_s1 }
  0x1e   :  { %v87_v6 = vadd.f32 %v78_v5, %v77_v4  ;;  %s167_s21 = scalar_lea.vmem %s101_s1, 384  ;;  %p172_p11 = scmp.lt.s32.totalorder %s101_s1, %s101_s1 }
  0x1f   :  { %123 = vtanh.f32 %v69_v2  ;;  %p168_p10 = scmp.ne.s32.totalorder %s101_s1, %s167_s21  ;;  %p173_p12 = scmp.lt.s32.totalorder %s167_s21, %s167_s21 }
  0x20   :  { %125 = vtanh.f32 %v70_v3  ;;  %89 = vst [vmem:[#allocation7 + $0x8] sm:$0xff] %v87_v6 }
  0x21   :  { %p174_p13 = por %p173_p12, %p172_p11 }
  0x23   :  { %p175_p0 = pnand %p174_p13, %p168_p10 }
  0x2c   :  { %v124_v7 = vpop.eup %123 }
  0x2d   :  { %v126_v8 = vpop.eup %125  ;;  %v73_v9 = vmul.f32 0.5, %v124_v7 }
  0x2e   :  { %v74_v10 = vmul.f32 0.5, %v126_v8 }
  0x2f   :  { %v75_v11 = vadd.f32 0.5, %v73_v9 }
  0x30   :  { %v76_v12 = vadd.f32 0.5, %v74_v10 }
  0x31   :  { %v80_v13 = vmul.f32 %v77_v4, %v75_v11 }
  0x32   :  { %v81_v14 = vmul.f32 %v78_v5, %v76_v12  ;;  %v92_v15 = vadd.f32 %v76_v12, %v75_v11 }
  0x34   :  { %v82_v16 = vadd.f32 %v81_v14, %v80_v13  ;;  %94 = vst [vmem:[#allocation7 + $0x10] sm:$0xff] %v92_v15 }
  0x36   :  { %84 = vst [vmem:[#allocation7] sm:$0xff] %v82_v16 }
  0x37   :  { %178 = shalt.err (!%p175_p0)
}
  0x38   :  { %106 = dma.vmem_to_hbm [thread:$0]  %s101_s1, 384, %s233_s2, [#allocation4], %s194_s12, %s194_s12, %s195_s13  }
  0x39   :  { %191 = dma.done.wait [#allocation4], 384  }
  0x3a   :  { %192 = vsyncadd [#allocation4], 4294966912 }
  0x3b   :  { %110 = vsyncpa [#allocation3], 1 }
  0x3c   :  { %111 = vsyncpa [#allocation6], 1 }
  0x3d   :  { %112 = vsyncpa [#allocation4], 1 }

</bundles_post_ra>
